<compile_context>
chip_gen: v7x
topology: tpu7x:2x2x1
jax: 0.10.0
libtpu: 0.0.40
codegen_flags: <defaults>
</compile_context>

<pallas_src>
import functools

import jax
import jax.numpy as jnp
from jax.experimental import pallas as pl
from jax.experimental.pallas import tpu as pltpu

_SUBLANE = 8                 # f32 sublane granularity (second-to-last dim)
_MAX_TM = 512                # upper bound on the batch tile
_VREG_BUDGET = 256 * 1024    # ~vreg file (64 x 4 KiB); bound the live h tile


def _round_up(x, m):
    return (x + m - 1) // m * m


def _apply_act(y, act):
    if act == "relu":
        return jnp.maximum(y, 0.0)
    if act == "gelu":
        # exact erf GELU to match PyTorch F.gelu's default
        return jax.nn.gelu(y, approximate=False)
    if act == "tanh":
        return jnp.tanh(y)
    if act == "sigmoid":
        return jax.nn.sigmoid(y)
    if act == "none":
        return y
    raise ValueError(f"unsupported act: {act}")


def _fused_mlp_kernel(*refs, acts, compute_dtype):
    """refs = (x_ref, w0_ref, b0_ref, w1_ref, b1_ref, ..., o_ref).

    x_ref: [tm, K0]   w_i: [K_i, N_i] (bf16)   b_i: [1, N_i] (f32)   o_ref: [tm, N_last]
    Intermediate activations never leave vregs/VMEM; dots run on the MXU bf16
    path with f32 accumulation, bias/activation math stays f32.
    """
    x_ref = refs[0]
    o_ref = refs[-1]
    layer_refs = refs[1:-1]
    depth = len(acts)
    assert len(layer_refs) == 2 * depth

    h = x_ref[...].astype(jnp.float32)
    for i in range(depth):
        w_ref = layer_refs[2 * i]
        b_ref = layer_refs[2 * i + 1]
        y = jnp.dot(h.astype(compute_dtype), w_ref[...].astype(compute_dtype),
                    preferred_element_type=jnp.float32)
        y = y + b_ref[...].astype(jnp.float32)   # (1, N) broadcasts over (tm, N)
        h = _apply_act(y, acts[i])
    o_ref[...] = h.astype(o_ref.dtype)


def init_mlp_params(key, units_list, dtype=jnp.float32):
    """nn.Linear-style uniform(-1/sqrt(fan_in), 1/sqrt(fan_in)) init.

    Weights stored [in, out] (transposed from PyTorch's [out, in]); bias [1, out].
    """
    params = []
    depth = len(units_list) - 1
    keys = jax.random.split(key, 2 * depth)
    for i in range(depth):
        fan_in, fan_out = units_list[i], units_list[i + 1]
        bound = 1.0 / (fan_in ** 0.5)
        w = jax.random.uniform(keys[2 * i], (fan_in, fan_out), dtype, -bound, bound)
        b = jax.random.uniform(keys[2 * i + 1], (1, fan_out), dtype, -bound, bound)
        params.append((w, b))
    return params


def pack_mlp_params(params, weight_dtype=jnp.bfloat16):
    """Cast weights to bf16 for the MXU fast path; biases stay f32.

    No 128-padding: full-extent BlockSpecs satisfy the (8,128) rule and the
    vreg layout handles sub-128 dims internally, so padding only inflated
    VMEM/DMA without changing the math.
    """
    return [(w.astype(weight_dtype), b.astype(jnp.float32)) for w, b in params]


@functools.partial(jax.jit, static_argnames=("act_fn",))
def mlp_forward(x, packed_params, *, act_fn):
    """Whole-MLP forward as one Pallas call; returns [batch, out_features]."""
    m, k = x.shape
    depth = len(packed_params)
    acts = tuple(act_fn for _ in range(depth - 1)) + ("sigmoid",)
    n_last = packed_params[-1][0].shape[1]
    widest = max([k] + [w.shape[1] for w, _ in packed_params])

    # --- batch tiling -------------------------------------------------------
    mp8 = _round_up(m, _SUBLANE)
    tm = min(_MAX_TM, mp8)
    # Keep the live activation tile (tm x widest, f32) roughly within the vreg file.
    tm = min(tm, max(_SUBLANE, (_VREG_BUDGET // (4 * widest)) // _SUBLANE * _SUBLANE))
    # Prefer >=2 grid steps so the parallel batch axis can shard across v7x's 2 TCs.
    if mp8 <= tm and mp8 >= 2 * _SUBLANE:
        tm = _round_up(mp8 // 2, _SUBLANE)
    tm = max(tm, _SUBLANE)
    mp = _round_up(mp8, tm)
    grid_m = mp // tm

    # Only pad the batch dim, and only when actually needed (no K padding at all).
    xp = x if mp == m else jnp.pad(x, ((0, mp - m), (0, 0)))

    # --- operands & specs ---------------------------------------------------
    operands = [xp]
    in_specs = [pl.BlockSpec((tm, k), lambda i: (i, 0))]
    for w, b in packed_params:
        operands += [w, b]
        # Constant index_map -> a second pipeline buffer is pure waste; single-buffer.
        in_specs += [
            pl.BlockSpec(w.shape, lambda i: (0, 0), pipeline_mode=pl.Buffered(1)),
            pl.BlockSpec(b.shape, lambda i: (0, 0), pipeline_mode=pl.Buffered(1)),
        ]

    # --- cost estimate & VMEM budget ---------------------------------------
    flops = 2 * mp * sum(w.shape[0] * w.shape[1] for w, _ in packed_params)
    transc = mp * n_last  # final sigmoid
    if act_fn in ("gelu", "tanh", "sigmoid"):
        transc += mp * sum(w.shape[1] for w, _ in packed_params[:-1])
    param_bytes = sum(w.size * w.dtype.itemsize + b.size * b.dtype.itemsize
                      for w, b in packed_params)
    out_bytes = mp * n_last * x.dtype.itemsize
    bytes_accessed = xp.size * xp.dtype.itemsize + param_bytes + out_bytes
    cost = pl.CostEstimate(flops=flops, transcendentals=transc,
                           bytes_accessed=bytes_accessed)

    stream_bytes = 2 * (tm * k * 4 + tm * n_last * 4)     # double-buffered x/out tiles
    live_bytes = 2 * tm * widest * 4                       # in-kernel activations (rough)
    vmem_limit = int(1.5 * (param_bytes + stream_bytes + live_bytes)) + (4 << 20)
    vmem_limit = max(16 << 20, min(vmem_limit, 60 << 20))  # stay under v7x's 64 MiB

    semantics = ("parallel",) if grid_m > 1 else ("arbitrary",)

    kernel = functools.partial(_fused_mlp_kernel, acts=acts,
                               compute_dtype=jnp.bfloat16)
    out = pl.pallas_call(
        kernel,
        out_shape=jax.ShapeDtypeStruct((mp, n_last), x.dtype),
        grid=(grid_m,),
        in_specs=in_specs,
        out_specs=pl.BlockSpec((tm, n_last), lambda i: (i, 0)),
        compiler_params=pltpu.CompilerParams(
            dimension_semantics=semantics,
            vmem_limit_bytes=vmem_limit,
        ),
        cost_estimate=cost,
    )(*operands)

    return out if mp == m else out[:m]


def mlp_reference(x, packed_params, act_fn, compute_dtype=jnp.bfloat16):
    """Pure-JAX reference mirroring the kernel's bf16-operand / f32-accum path."""
    h = x.astype(jnp.float32)
    depth = len(packed_params)
    for i, (w, b) in enumerate(packed_params):
        y = jnp.dot(h.astype(compute_dtype), w.astype(compute_dtype),
                    preferred_element_type=jnp.float32) + b.astype(jnp.float32)
        h = _apply_act(y, act_fn) if i < depth - 1 else jax.nn.sigmoid(y)
    return h.astype(x.dtype)


if __name__ == "__main__":
    key = jax.random.PRNGKey(0)
    k_x, k_p = jax.random.split(key)

    units_list = [32, 64, 16]   # MLP(units_list=[32, 64, 16], act_fn="relu")
    act_fn = "relu"
    batch = 8

    x = jax.random.normal(k_x, (batch, units_list[0]), dtype=jnp.float32)
    params = init_mlp_params(k_p, units_list)
    packed = pack_mlp_params(params)   # bf16 weights, f32 biases (done once)

    out = mlp_forward(x, packed, act_fn=act_fn)
    out = jax.block_until_ready(out)

    ref = mlp_reference(x, packed, act_fn)
    assert out.shape == (batch, units_list[-1])
    assert jnp.allclose(out, ref, atol=1e-4, rtol=1e-4), "mismatch vs reference"

    print("KERNEL_OK")
</pallas_src>

<mosaic_0001>
module attributes {stable_mosaic.version = 11 : i64} {
  func.func @_fused_mlp_kernel(%arg0: i32, %arg1: memref<8x32xf32, #tpu.memory_space<vmem>>, %arg2: memref<32x64xbf16, #tpu.memory_space<vmem>>, %arg3: memref<1x64xf32, #tpu.memory_space<vmem>>, %arg4: memref<64x16xbf16, #tpu.memory_space<vmem>>, %arg5: memref<1x16xf32, #tpu.memory_space<vmem>>, %arg6: memref<8x16xf32, #tpu.memory_space<vmem>>) attributes {dimension_semantics = [#tpu.dimension_semantics<arbitrary>], iteration_bounds = array<i64: 1>, scalar_prefetch = 0 : i64, scratch_operands = 0 : i64, tpu.core_type = #tpu.core_type<tc>, window_params = [{transform_indices = @transform_0, window_bounds = array<i64: 8, 32>}, {pipeline_mode = #tpu.pipeline_mode<synchronous>, transform_indices = @transform_1, window_bounds = array<i64: 32, 64>}, {pipeline_mode = #tpu.pipeline_mode<synchronous>, transform_indices = @transform_2, window_bounds = array<i64: 1, 64>}, {pipeline_mode = #tpu.pipeline_mode<synchronous>, transform_indices = @transform_3, window_bounds = array<i64: 64, 16>}, {pipeline_mode = #tpu.pipeline_mode<synchronous>, transform_indices = @transform_4, window_bounds = array<i64: 1, 16>}, {transform_indices = @transform_5, window_bounds = array<i64: 8, 16>}]} {
    %c0 = arith.constant 0 : index
    %c0_0 = arith.constant 0 : index
    %0 = vector.load %arg1[%c0, %c0_0] : memref<8x32xf32, #tpu.memory_space<vmem>>, vector<8x32xf32>
    %1 = arith.truncf %0 : vector<8x32xf32> to vector<8x32xbf16>
    %c0_1 = arith.constant 0 : index
    %c0_2 = arith.constant 0 : index
    %2 = vector.load %arg2[%c0_1, %c0_2] : memref<32x64xbf16, #tpu.memory_space<vmem>>, vector<32x64xbf16>
    %cst = arith.constant dense<0.000000e+00> : vector<8x64xf32>
    %3 = tpu.matmul %1, %2, %cst {dimension_numbers = #tpu.dot_dimension_numbers<[1], [0], [0], [1], [0, 0, 1, 1], [], []>} : vector<8x32xbf16>, vector<32x64xbf16>, vector<8x64xf32> -> vector<8x64xf32>
    %c0_3 = arith.constant 0 : index
    %c0_4 = arith.constant 0 : index
    %4 = vector.load %arg3[%c0_3, %c0_4] : memref<1x64xf32, #tpu.memory_space<vmem>>, vector<1x64xf32>
    %5 = vector.broadcast %4 : vector<1x64xf32> to vector<8x64xf32>
    %6 = arith.addf %3, %5 : vector<8x64xf32>
    %cst_5 = arith.constant 0.000000e+00 : f32
    %7 = vector.broadcast %cst_5 : f32 to vector<8x64xf32>
    %8 = arith.maximumf %6, %7 : vector<8x64xf32>
    %9 = arith.truncf %8 : vector<8x64xf32> to vector<8x64xbf16>
    %c0_6 = arith.constant 0 : index
    %c0_7 = arith.constant 0 : index
    %10 = vector.load %arg4[%c0_6, %c0_7] : memref<64x16xbf16, #tpu.memory_space<vmem>>, vector<64x16xbf16>
    %cst_8 = arith.constant dense<0.000000e+00> : vector<8x16xf32>
    %11 = tpu.matmul %9, %10, %cst_8 {dimension_numbers = #tpu.dot_dimension_numbers<[1], [0], [0], [1], [0, 0, 1, 1], [], []>} : vector<8x64xbf16>, vector<64x16xbf16>, vector<8x16xf32> -> vector<8x16xf32>
    %c0_9 = arith.constant 0 : index
    %c0_10 = arith.constant 0 : index
    %12 = vector.load %arg5[%c0_9, %c0_10] : memref<1x16xf32, #tpu.memory_space<vmem>>, vector<1x16xf32>
    %13 = vector.broadcast %12 : vector<1x16xf32> to vector<8x16xf32>
    %14 = arith.addf %11, %13 : vector<8x16xf32>
    %15 = arith.negf %14 : vector<8x16xf32>
    %16 = math.exp %15 : vector<8x16xf32>
    %cst_11 = arith.constant 1.000000e+00 : f32
    %17 = vector.broadcast %cst_11 : f32 to vector<8x16xf32>
    %18 = arith.addf %17, %16 : vector<8x16xf32>
    %19 = arith.divf %17, %18 : vector<8x16xf32>
    %c0_12 = arith.constant 0 : index
    %c0_13 = arith.constant 0 : index
    %20 = vector.load %arg6[%c0_12, %c0_13] : memref<8x16xf32, #tpu.memory_space<vmem>>, vector<8x16xf32>
    tpu.vector_store %arg6[%c0_12, %c0_13], %19 {strides = array<i32>} : memref<8x16xf32, #tpu.memory_space<vmem>>, vector<8x16xf32>,
    return
  }
  func.func @transform_0(%arg0: i32) -> (i32, i32) {
    %c0_i32 = arith.constant 0 : i32
    %c0_i32_0 = arith.constant 0 : i32
    return %arg0, %c0_i32 : i32, i32
  }
  func.func @transform_1(%arg0: i32) -> (i32, i32) {
    %c0_i32 = arith.constant 0 : i32
    %c0_i32_0 = arith.constant 0 : i32
    %c0_i32_1 = arith.constant 0 : i32
    return %c0_i32, %c0_i32_0 : i32, i32
  }
  func.func @transform_2(%arg0: i32) -> (i32, i32) {
    %c0_i32 = arith.constant 0 : i32
    %c0_i32_0 = arith.constant 0 : i32
    %c0_i32_1 = arith.constant 0 : i32
    return %c0_i32, %c0_i32_0 : i32, i32
  }
  func.func @transform_3(%arg0: i32) -> (i32, i32) {
    %c0_i32 = arith.constant 0 : i32
    %c0_i32_0 = arith.constant 0 : i32
    %c0_i32_1 = arith.constant 0 : i32
    return %c0_i32, %c0_i32_0 : i32, i32
  }
  func.func @transform_4(%arg0: i32) -> (i32, i32) {
    %c0_i32 = arith.constant 0 : i32
    %c0_i32_0 = arith.constant 0 : i32
    %c0_i32_1 = arith.constant 0 : i32
    return %c0_i32, %c0_i32_0 : i32, i32
  }
  func.func @transform_5(%arg0: i32) -> (i32, i32) {
    %c0_i32 = arith.constant 0 : i32
    %c0_i32_0 = arith.constant 0 : i32
    return %arg0, %c0_i32 : i32, i32
  }
}

</mosaic_0001>

<bundles_post_ra>
// kernel: mlp_forward.1
= control target key start
LH: loop header
LB: loop body
LE: loop exit
PB: predicated region body
PF: predicated region fallthrough
CT: control target
= control target key end

     0   :  { %v274_v1 = vmov 0.0   ;;  %vm275_vm0 = vmmov 0   ;;  %vm47_vm1 = vcmask 261120   ;;  %s346_s0 = inlined_call_operand.vmem [shape: f32[8,32], index: 0, kind: input, shape index: {}]   ;;  %s347_s1 = inlined_call_operand.vmem [shape: bf16[32,64], index: 1, kind: input, shape index: {}]   ;;  %s348_s2 = inlined_call_operand.vmem [shape: f32[1,64], index: 2, kind: input, shape index: {}]   ;;  %s349_s3 = inlined_call_operand.vmem [shape: bf16[64,16], index: 3, kind: input, shape index: {}]   ;;  %s350_s4 = inlined_call_operand.vmem [shape: f32[1,16], index: 4, kind: input, shape index: {}]   ;;  %s351_s5 = inlined_call_operand.hbm [shape: f32[8,16], index: 5, kind: output, shape index: {}]  }
   0x1   :  { %v240_v0 = vld [vmem:[%s347_s1] sm:$0xff]   ;;  %217 = vmatprep.subr.bf16.mxu0 %v274_v1  ;;  %v241_v2 = vld [vmem:[%s347_s1 + $0x8] sm:$0xff]   ;;  %225 = vmatprep.subr.bf16.mxu1 %v274_v1 }
   0x2   :  { %218 = vmatpush3.bf16.msra.mxu0 %v240_v0  ;;  %221 = vmatprep.mubr.msk.bf16.mxu0 %vm275_vm0, %v274_v1  ;;  %v22_v3 = vld [vmem:[%s346_s0] sm:$0xff]  ;;  %v243_v5 = vld [vmem:[%s349_s3 + $0x8] sm:$0xff]  }
   0x3   :  { %219 = vmatprep.subr.bf16.mxu0 %v274_v1  ;;  %v242_v4 = vld [vmem:[%s349_s3] sm:$0xff]   ;;  %233 = vmatprep.mubr.msk.bf16.mxu1 %vm275_vm0, %v274_v1  ;;  %v23_v6 = vpack.c.bf16 %v22_v3, %v22_v3 }
   0x4   :  { %226 = vmatpush3.bf16.msra.mxu1 %v242_v4 }
   0x5   :  { %227 = vmatprep.subr.bf16.mxu1 %v274_v1 }
   0x6   :  { %220 = vmatpush3.bf16.msra.mxu0 %v241_v2 }
   0x7   :  { %10 = vsyncpa [#allocation3], 0  ;;  %v244_v7 = vld [vmem:[%s349_s3 + $0x10] sm:$0xff]   ;;  %v245_v8 = vld [vmem:[%s349_s3 + $0x18] sm:$0xff]   ;;  %vm132_vm2 = vcmask 523264   ;;  %vm182_vm3 = vcmask 130048  }
   0x8   :  { %228 = vmatpush3.bf16.msra.mxu1 %v243_v5  ;;  %v198_v9 = vld [vmem:[%s348_s2] ss:$0 sm:$0xff]  ;;  %s276_s2 = smov [#allocation2]  }
   0x9   :  { %222 = vmatmul.mubr.msk.bf16.vlgmr.msra.gmra.mrb[0].mxu0 %vm47_vm1, %v23_v6  ;;  %229 = vmatprep.subr.bf16.mxu1 %v274_v1  ;;  %v202_v17 = vld [vmem:[%s350_s4] ss:$0 sm:$0xff]  ;;  %s190_s3 = sshll.u32 %s276_s2, 4  ;;  %s191_s3 = int_to_ptr.vmem [resolvable:$true] %s190_s3 }
   0xa   :  { %s250_s9 = scalar_lea.vmem %s191_s3, 128  ;;  %p255_p1 = scmp.lt.s32.totalorder %s191_s3, %s191_s3 }
   0xb   :  { %p251_p0 = scmp.ne.s32.totalorder %s191_s3, %s250_s9  ;;  %p256_p2 = scmp.lt.s32.totalorder %s250_s9, %s250_s9 }
   0xc   :  { %230 = vmatpush3.bf16.msra.mxu1 %v244_v7 }
   0xd   :  { %231 = vmatprep.subr.bf16.mxu1 %v274_v1  ;;  %p257_p3 = por %p256_p2, %p255_p1 }
   0xf   :  { %p258_p4 = pnand %p257_p3, %p251_p0 }
  0x10   :  { %232 = vmatpush3.bf16.msra.mxu1 %v245_v8 }
  0xdc   :  { %v85_v10 = vpop.f32.mrb[0].mxu0 }
  0xdd   :  { %v86_v11 = vadd.f32 %v198_v9, %v85_v10  ;;  %v223_v12 = vpop.f32.mrb[1].mxu0 }
  0xde   :  { %v88_v13 = vpop.f32.mrb[2].mxu0 }
  0xdf   :  { %v91_v14 = vmax.f32 %v86_v11, 0.0  ;;  %v224_v15 = vpop.f32.mrb[3].mxu0 }
  0xe1   :  { %v92_v16 = vpack.c.bf16 %v91_v14, %v91_v14 }
  0xe3   :  { %234 = vmatmul.mubr.msk.bf16.vlgmr.msra.gmra.mrb[0].mxu1 %vm132_vm2, %v92_v16 }
 0x1b6   :  { %v170_v18 = vpop.f32.mrb[0].mxu1 }
 0x1b7   :  { %v171_v19 = vadd.f32 %v202_v17, %v170_v18  ;;  %v235_v20 = vpop.f32.mrb[1].mxu1 }
 0x1b8   :  { %v173_v21 = vpop.f32.mrb[2].mxu1 }
 0x1b9   :  { %v208_v22 = vmul.f32 -1.442695, %v171_v19  ;;  %v236_v23 = vpop.f32.mrb[3].mxu1 }
 0x1bb   :  { %246 = vpow2.f32 %v208_v22 }
 0x1c5   :  { %v247_v24 = vpop.eup %246 }
 0x1c6   :  { %v179_v25 = vadd.f32 1.0, %v247_v24 }
 0x1c8   :  { %248 = vrcp.f32 %v179_v25 }
 0x1d2   :  { %v249_v26 = vpop.eup %248 }
 0x1d3   :  { %183 = vst.msk [vmem:[#allocation2] sm:$0xff] %vm182_vm3, %v249_v26 }
 0x1d4   :  { %261 = shalt.err (!%p258_p4)
}
 0x1d5   :  { %s262_s11 = scalar_lea.hbm %s351_s5, 128 }
 0x1d6   :  { %p263_p5 = scmp.ne.s32.totalorder %s351_s5, %s262_s11  ;;  %p266_p6 = scmp.lt.u32.totalorder %s262_s11, %s351_s5 }
 0x1d8   :  { %p268_p7 = pnand %p266_p6, %p263_p5 }
 0x1da   :  { %271 = shalt.err (!%p268_p7)
}
 0x1db   :  { %193 = dma.vmem_to_hbm [thread:$0]  %s191_s3, 128, %s351_s5, [#allocation3]  }
 0x1dc   :  { %272 = dma.done.wait [#allocation3], 128  }
 0x1dd   :  { %273 = vsyncadd [#allocation3], 4294967168 }
 0x1de   :  { %197 = vsyncpa [#allocation3], 1 }

</bundles_post_ra>
